<compile_context>
chip_gen: v5e
topology: v5e:2x2
jax: 0.10.0
libtpu: 0.0.40
codegen_flags: <defaults>
</compile_context>

<pallas_src>
import functools

import jax
import jax.numpy as jnp
from jax.experimental import pallas as pl
from jax.experimental.pallas import tpu as pltpu


def _spectrogram_kernel(re_ref, im_ref, out_ref, *, power):
    """Elementwise (re^2 + im^2)^(power/2) on one (tile_m, lane) block."""
    re = re_ref[...].astype(jnp.float32)
    im = im_ref[...].astype(jnp.float32)
    sumsq = re * re + im * im
    if power == 2:
        mag = sumsq
    elif power == 1:
        mag = jnp.sqrt(sumsq)
    else:
        mag = jnp.power(sumsq, power / 2.0)
    out_ref[...] = mag.astype(out_ref.dtype)


def spectrogram(stft_f, power=1, mono=False, *, lane=1024, tile_m=512):
    """Pallas equivalent of Spectrogram.forward.

    Args:
      stft_f: (nb_samples, nb_channels, nb_bins, nb_frames, 2) float array.
      power:  spectrogram power (1 = magnitude, 2 = power).
      mono:   if True, average over the channel dimension (keepdim).

    Returns:
      (nb_frames, nb_samples, nb_channels, nb_bins) spectrogram
      (nb_channels == 1 if mono).
    """
    S, C, B, F, two = stft_f.shape
    assert two == 2, "last dim must hold (real, imag)"
    n = S * C * B * F

    # Adapt tile sizes for tiny problems (keep lane a multiple of 128 and
    # tile_m a multiple of 8 so the (8, 128) block constraint always holds).
    while lane > 128 and n < lane:
        lane //= 2
    rows = pl.cdiv(n, lane)
    while tile_m > 8 and rows < tile_m:
        tile_m //= 2

    # Split re/im in the ORIGINAL layout (no transpose of the interleaved tensor),
    # flatten, and add only a < lane tail pad so the flat view reshapes cleanly.
    # slice + reshape + pad fuse into one XLA producer (and, with
    # allow_input_fusion, potentially into the pallas input DMA itself).
    re = stft_f[..., 0].reshape(-1)
    im = stft_f[..., 1].reshape(-1)
    pad = rows * lane - n
    if pad:
        re = jnp.pad(re, (0, pad))
        im = jnp.pad(im, (0, pad))
    re = re.reshape(rows, lane)
    im = im.reshape(rows, lane)

    kernel = functools.partial(_spectrogram_kernel, power=power)
    mag_flat = pl.pallas_call(
        kernel,
        out_shape=jax.ShapeDtypeStruct((rows, lane), stft_f.dtype),
        grid_spec=pltpu.PrefetchScalarGridSpec(
            num_scalar_prefetch=0,
            grid=(pl.cdiv(rows, tile_m),),
            in_specs=[
                pl.BlockSpec((tile_m, lane), lambda i: (i, 0)),
                pl.BlockSpec((tile_m, lane), lambda i: (i, 0)),
            ],
            out_specs=pl.BlockSpec((tile_m, lane), lambda i: (i, 0)),
        ),
        compiler_params=pltpu.CompilerParams(
            dimension_semantics=("parallel",),
            vmem_limit_bytes=32 * 1024 * 1024,
            allow_input_fusion=[True, True],
        ),
    )(re, im)

    # Glue on the half-sized magnitude output only.
    mag = mag_flat.reshape(-1)[:n].reshape(S, C, B, F)
    if mono:
        # Channel mean kept in XLA (cheap vs. the streaming hot path).
        mag = jnp.mean(mag, axis=1, keepdims=True)
    return jnp.transpose(mag, (3, 0, 1, 2))  # (F, S, C, B)


def _spectrogram_ref(stft_f, power=1, mono=False):
    """Pure-JAX reference mirroring the PyTorch forward exactly."""
    x = jnp.swapaxes(stft_f, 2, 3)                         # transpose(2, 3)
    x = jnp.power(jnp.sum(x ** 2, axis=-1), power / 2.0)   # pow(2).sum(-1).pow(p/2)
    if mono:
        x = jnp.mean(x, axis=1, keepdims=True)
    return jnp.transpose(x, (2, 0, 1, 3))                  # permute(2, 0, 1, 3)


if __name__ == "__main__":
    key = jax.random.PRNGKey(0)

    # Small canonical test shape.
    nb_samples, nb_channels, nb_bins, nb_frames = 2, 2, 16, 8
    stft_small = jax.random.normal(
        key, (nb_samples, nb_channels, nb_bins, nb_frames, 2), dtype=jnp.float32)

    out = jax.block_until_ready(spectrogram(stft_small, power=1, mono=False))
    ref = _spectrogram_ref(stft_small, power=1, mono=False)
    assert out.shape == (nb_frames, nb_samples, nb_channels, nb_bins), out.shape
    assert jnp.allclose(out, ref, atol=1e-5, rtol=1e-5), "mismatch (power=1)"

    out2 = jax.block_until_ready(spectrogram(stft_small, power=2, mono=True))
    ref2 = _spectrogram_ref(stft_small, power=2, mono=True)
    assert out2.shape == (nb_frames, nb_samples, 1, nb_bins), out2.shape
    assert jnp.allclose(out2, ref2, atol=1e-5, rtol=1e-5), "mismatch (power=2, mono)"

    # Slightly larger odd-sized shape to exercise the lane tail pad and the
    # ragged final row-block path.
    stft_odd = jax.random.normal(
        jax.random.PRNGKey(1), (1, 2, 257, 100, 2), dtype=jnp.float32)
    out3 = jax.block_until_ready(spectrogram(stft_odd, power=1, mono=False))
    ref3 = _spectrogram_ref(stft_odd, power=1, mono=False)
    assert out3.shape == (100, 1, 2, 257), out3.shape
    assert jnp.allclose(out3, ref3, atol=1e-5, rtol=1e-5), "mismatch (odd shape)"

    print("KERNEL_OK")
</pallas_src>

<mosaic_0001>
module attributes {stable_mosaic.version = 11 : i64} {
  func.func @_spectrogram_kernel(%arg0: i32, %arg1: memref<8x512xf32, #tpu.memory_space<vmem>>, %arg2: memref<8x512xf32, #tpu.memory_space<vmem>>, %arg3: memref<8x512xf32, #tpu.memory_space<vmem>>) attributes {dimension_semantics = [#tpu.dimension_semantics<parallel>], iteration_bounds = array<i64: 1>, scalar_prefetch = 0 : i64, scratch_operands = 0 : i64, tpu.core_type = #tpu.core_type<tc>, window_params = [{transform_indices = @transform_0, window_bounds = array<i64: 8, 512>}, {transform_indices = @transform_1, window_bounds = array<i64: 8, 512>}, {transform_indices = @transform_2, window_bounds = array<i64: 8, 512>}]} {
    %c0 = arith.constant 0 : index
    %c0_0 = arith.constant 0 : index
    %0 = vector.load %arg1[%c0, %c0_0] : memref<8x512xf32, #tpu.memory_space<vmem>>, vector<8x512xf32>
    %c0_1 = arith.constant 0 : index
    %c0_2 = arith.constant 0 : index
    %1 = vector.load %arg2[%c0_1, %c0_2] : memref<8x512xf32, #tpu.memory_space<vmem>>, vector<8x512xf32>
    %2 = arith.mulf %0, %0 : vector<8x512xf32>
    %3 = arith.mulf %1, %1 : vector<8x512xf32>
    %4 = arith.addf %2, %3 : vector<8x512xf32>
    %5 = math.sqrt %4 : vector<8x512xf32>
    %c0_3 = arith.constant 0 : index
    %c0_4 = arith.constant 0 : index
    %6 = vector.load %arg3[%c0_3, %c0_4] : memref<8x512xf32, #tpu.memory_space<vmem>>, vector<8x512xf32>
    tpu.vector_store %arg3[%c0_3, %c0_4], %5 {strides = array<i32>} : memref<8x512xf32, #tpu.memory_space<vmem>>, vector<8x512xf32>,
    return
  }
  func.func @transform_0(%arg0: i32) -> (i32, i32) {
    %c0_i32 = arith.constant 0 : i32
    %c0_i32_0 = arith.constant 0 : i32
    return %arg0, %c0_i32 : i32, i32
  }
  func.func @transform_1(%arg0: i32) -> (i32, i32) {
    %c0_i32 = arith.constant 0 : i32
    %c0_i32_0 = arith.constant 0 : i32
    return %arg0, %c0_i32 : i32, i32
  }
  func.func @transform_2(%arg0: i32) -> (i32, i32) {
    %c0_i32 = arith.constant 0 : i32
    %c0_i32_0 = arith.constant 0 : i32
    return %arg0, %c0_i32 : i32, i32
  }
}

</mosaic_0001>

<bundles_post_ra>
// kernel: tpu_custom_call.1
= control target key start
LH: loop header
LB: loop body
LE: loop exit
PB: predicated region body
PF: predicated region fallthrough
CT: control target
= control target key end

     0   :  { %7 = vsyncpa [#allocation3], 0  ;;  %s465_s0 = inlined_call_operand.hbm [shape: f32[1,512], index: 0, kind: input, shape index: {}]   ;;  %s466_s1 = inlined_call_operand.hbm [shape: f32[1,512], index: 1, kind: input, shape index: {}]   ;;  %s467_s2 = inlined_call_operand.hbm [shape: f32[1,512], index: 2, kind: output, shape index: {}]  }
   0x1   :  { %8 = vsyncpa [#allocation6], 0 }
   0x2   :  { %9 = vsyncpa [#allocation4], 0 }
   0x3   :  { %13 = vsyncadd [#allocation3], 448  ;;  %s14_s11 = sshll.u32 %s465_s0, 4  ;;  %s311_s12 = smov [#allocation2]   ;;  %s15_s11 = int_to_ptr.hbm [resolvable:$true] %s14_s11 }
   0x4   :  { %s16_s13 = sshll.u32 %s311_s12, 4  ;;  %s312_s14 = smov 64   ;;  %s17_s13 = int_to_ptr.vmem [resolvable:$true] %s16_s13 }
   0x5   :  { %s313_s15 = smov 4  }
   0x6   :  { %22 = dma.hbm_to_vmem [thread:$0]  %s15_s11, 64, %s17_s13, [#allocation3], %s312_s14, %s312_s14, %s313_s15  }
   0x7   :  { %26 = vsyncadd [#allocation6], 448  ;;  %s27_s18 = sshll.u32 %s466_s1, 4  ;;  %s314_s19 = smov [#allocation5]   ;;  %s28_s18 = int_to_ptr.hbm [resolvable:$true] %s27_s18 }
   0x8   :  { %s29_s20 = sshll.u32 %s314_s19, 4  ;;  %s30_s20 = int_to_ptr.vmem [resolvable:$true] %s29_s20 }
   0x9   :  { %35 = dma.hbm_to_vmem [thread:$0]  %s28_s18, 64, %s30_s20, [#allocation6], %s312_s14, %s312_s14, %s313_s15  }
   0xa   :  { %305 = dma.done.wait [#allocation3], 512  }
   0xb   :  { %306 = vsyncadd [#allocation3], 4294966784 }
   0xc   :  { %307 = dma.done.wait [#allocation6], 512  }
   0xd   :  { %308 = vsyncadd [#allocation6], 4294966784  ;;  %v44_v0 = vld [vmem:[#allocation2] sm:$0xf]  ;;  %v45_v2 = vld [vmem:[#allocation2 + $0x4] sm:$0xf]  ;;  %v180_v38 = vlaneseq }
   0xe   :  { %v52_v1 = vld [vmem:[#allocation5] sm:$0xf]  ;;  %v60_v3 = vmul.f32 %v44_v0, %v44_v0  ;;  %v53_v5 = vld [vmem:[#allocation5 + $0x4] sm:$0xf]  ;;  %v61_v6 = vmul.f32 %v45_v2, %v45_v2  ;;  %v46_v7 = vld [vmem:[#allocation2 + $0x8] sm:$0xf] }
   0xf   :  { %v68_v4 = vmul.f32 %v52_v1, %v52_v1  ;;  %v54_v8 = vld [vmem:[#allocation5 + $0x8] sm:$0xf]  ;;  %v69_v9 = vmul.f32 %v53_v5, %v53_v5  ;;  %v62_v10 = vmul.f32 %v46_v7, %v46_v7  ;;  %v47_v12 = vld [vmem:[#allocation2 + $0xc] sm:$0xf]  ;;  %v48_v14 = vld [vmem:[#allocation2 + $0x10] sm:$0xf] }
  0x10   :  { %v70_v11 = vmul.f32 %v54_v8, %v54_v8  ;;  %v55_v13 = vld [vmem:[#allocation5 + $0xc] sm:$0xf]  ;;  %v63_v16 = vmul.f32 %v47_v12, %v47_v12  ;;  %v56_v18 = vld [vmem:[#allocation5 + $0x10] sm:$0xf]  ;;  %v64_v21 = vmul.f32 %v48_v14, %v48_v14  ;;  %v49_v23 = vld [vmem:[#allocation2 + $0x14] sm:$0xf] }
  0x11   :  { %v343_v15 = vadd.f32 %v68_v4, %v60_v3  ;;  %v71_v17 = vmul.f32 %v55_v13, %v55_v13  ;;  %v345_v19 = vadd.f32 %v69_v9, %v61_v6  ;;  %v72_v22 = vmul.f32 %v56_v18, %v56_v18  ;;  %v57_v24 = vld [vmem:[#allocation5 + $0x14] sm:$0xf]  ;;  %v50_v25 = vld [vmem:[#allocation2 + $0x18] sm:$0xf]  ;;  %v51_v28 = vld [vmem:[#allocation2 + $0x1c] sm:$0xf] }
  0x12   :  { %v347_v20 = vadd.f32 %v70_v11, %v62_v10  ;;  %v58_v26 = vld [vmem:[#allocation5 + $0x18] sm:$0xf]  ;;  %v65_v27 = vmul.f32 %v49_v23, %v49_v23  ;;  %v59_v29 = vld [vmem:[#allocation5 + $0x1c] sm:$0xf]  ;;  %v73_v32 = vmul.f32 %v57_v24, %v57_v24  ;;  %v66_v33 = vmul.f32 %v50_v25, %v50_v25 }
  0x13   :  { %217 = vrsqrt.f32 %v343_v15  ;;  %v352_v30 = vadd.f32 %v71_v17, %v63_v16  ;;  %v354_v31 = vadd.f32 %v72_v22, %v64_v21  ;;  %v74_v34 = vmul.f32 %v58_v26, %v58_v26 }
  0x14   :  { %219 = vrsqrt.f32 %v345_v19  ;;  %v67_v35 = vmul.f32 %v51_v28, %v51_v28  ;;  %v75_v36 = vmul.f32 %v59_v29, %v59_v29  ;;  %v359_v41 = vadd.f32 %v73_v32, %v65_v27 }
  0x15   :  { %221 = vrsqrt.f32 %v347_v20  ;;  %v361_v42 = vadd.f32 %v74_v34, %v66_v33  ;;  %vm91_vm0 = vcmp.eq.f32.partialorder %v343_v15, inf  ;;  %v94_v44 = vand.u32 2147483648, %v343_v15 }
  0x16   :  { %223 = vrsqrt.f32 %v352_v30  ;;  %vm93_vm1 = vcmp.eq.f32.partialorder %v343_v15, 0.0  ;;  %v369_v48 = vadd.f32 %v75_v36, %v67_v35  ;;  %vm371_vm2 = vcmp.lt.s32.totalorder %v180_v38, 512 }
  0x17   :  { %225 = vrsqrt.f32 %v354_v31  ;;  %vm103_vm3 = vcmp.eq.f32.partialorder %v345_v19, inf  ;;  %vm105_vm4 = vcmp.eq.f32.partialorder %v345_v19, 0.0  ;;  %v106_v53 = vand.u32 2147483648, %v345_v19 }
  0x18   :  { %227 = vrsqrt.f32 %v359_v41  ;;  %vm115_vm5 = vcmp.eq.f32.partialorder %v347_v20, inf  ;;  %vm117_vm6 = vcmp.eq.f32.partialorder %v347_v20, 0.0  ;;  %v118_v57 = vand.u32 2147483648, %v347_v20 }
  0x19   :  { %v218_v37 = vpop.eup %217  ;;  %229 = vrsqrt.f32 %v361_v42  ;;  %vm127_vm7 = vcmp.eq.f32.partialorder %v352_v30, inf  ;;  %vm129_vm8 = vcmp.eq.f32.partialorder %v352_v30, 0.0  ;;  %v130_v0 = vand.u32 2147483648, %v352_v30 }
  0x1a   :  { %v220_v39 = vpop.eup %219  ;;  %v85_v40 = vmul.f32 %v218_v37, %v343_v15  ;;  %231 = vrsqrt.f32 %v369_v48  ;;  %vm139_vm9 = vcmp.eq.f32.partialorder %v354_v31, inf  ;;  %vm141_vm10 = vcmp.eq.f32.partialorder %v354_v31, 0.0 }
  0x1b   :  { %v222_v43 = vpop.eup %221  ;;  %v97_v45 = vmul.f32 %v220_v39, %v345_v19  ;;  %v142_v16 = vand.u32 2147483648, %v354_v31  ;;  %vm151_vm11 = vcmp.eq.f32.partialorder %v359_v41, inf  ;;  %vm153_vm12 = vcmp.eq.f32.partialorder %v359_v41, 0.0 }
  0x1c   :  { %v86_v46 = vmul.f32 %v218_v37, %v85_v40  ;;  %v109_v47 = vmul.f32 %v222_v43, %v347_v20  ;;  %v224_v51 = vpop.eup %223  ;;  %v154_v40 = vand.u32 2147483648, %v359_v41  ;;  %vm163_vm13 = vcmp.eq.f32.partialorder %v361_v42, inf }
  0x1d   :  { %v98_v50 = vmul.f32 %v220_v39, %v97_v45  ;;  %v226_v55 = vpop.eup %225  ;;  %v121_v58 = vmul.f32 %v224_v51, %v352_v30  ;;  %vm165_vm14 = vcmp.eq.f32.partialorder %v361_v42, 0.0  ;;  %vm175_vm15 = vcmp.eq.f32.partialorder %v369_v48, inf }
  0x1e   :  { %v87_v52 = vmul.f32 0.5, %v86_v46  ;;  %v110_v54 = vmul.f32 %v222_v43, %v109_v47  ;;  %v133_v61 = vmul.f32 %v226_v55, %v354_v31  ;;  %v228_v1 = vpop.eup %227 }
  0x1f   :  { %v99_v56 = vmul.f32 0.5, %v98_v50  ;;  %v122_v63 = vmul.f32 %v224_v51, %v121_v58  ;;  %v230_v5 = vpop.eup %229  ;;  %v145_v8 = vmul.f32 %v228_v1, %v359_v41  ;;  %v178_v58 = vand.u32 2147483648, %v369_v48 }
  0x20   :  { %v88_v59 = vsub.f32 1.5, %v87_v52  ;;  %v111_v60 = vmul.f32 0.5, %v110_v54  ;;  %v134_v4 = vmul.f32 %v226_v55, %v133_v61  ;;  %v157_v12 = vmul.f32 %v230_v5, %v361_v42  ;;  %v232_v18 = vpop.eup %231 }
  0x21   :  { %v100_v62 = vsub.f32 1.5, %v99_v56  ;;  %v123_v7 = vmul.f32 0.5, %v122_v63  ;;  %v146_v17 = vmul.f32 %v228_v1, %v145_v8 }
  0x22   :  { %v89_v2 = vmul.f32 %v218_v37, %v88_v59  ;;  %v112_v3 = vsub.f32 1.5, %v111_v60  ;;  %v135_v11 = vmul.f32 0.5, %v134_v4  ;;  %v158_v24 = vmul.f32 %v230_v5, %v157_v12 }
  0x23   :  { %v101_v6 = vmul.f32 %v220_v39, %v100_v62  ;;  %v124_v14 = vsub.f32 1.5, %v123_v7  ;;  %v147_v28 = vmul.f32 0.5, %v146_v17  ;;  %v169_v37 = vmul.f32 %v232_v18, %v369_v48 }
  0x24   :  { %v90_v9 = vmul.f32 %v89_v2, %v343_v15  ;;  %v113_v10 = vmul.f32 %v222_v43, %v112_v3  ;;  %v136_v23 = vsub.f32 1.5, %v135_v11  ;;  %v159_v34 = vmul.f32 0.5, %v158_v24 }
  0x25   :  { %v102_v13 = vmul.f32 %v101_v6, %v345_v19  ;;  %v125_v27 = vmul.f32 %v224_v51, %v124_v14  ;;  %v148_v36 = vsub.f32 1.5, %v147_v28  ;;  %v170_v43 = vmul.f32 %v232_v18, %v169_v37 }
  0x26   :  { %v92_v21 = vsel %vm91_vm0, %v343_v15, %v90_v9  ;;  %v114_v22 = vmul.f32 %v113_v10, %v347_v20  ;;  %v137_v33 = vmul.f32 %v226_v55, %v136_v23  ;;  %v160_v38 = vsub.f32 1.5, %v159_v34 }
  0x27   :  { %v95_v25 = vsel %vm93_vm1, %v94_v44, %v92_v21  ;;  %v104_v26 = vsel %vm103_vm3, %v345_v19, %v102_v13  ;;  %v126_v35 = vmul.f32 %v125_v27, %v352_v30  ;;  %v149_v39 = vmul.f32 %v228_v1, %v148_v36 }
  0x28   :  { %184 = vst.msk [vmem:[#allocation7] sm:$0xf] %vm371_vm2, %v95_v25  ;;  %v107_v29 = vsel %vm105_vm4, %v106_v53, %v104_v26  ;;  %v116_v32 = vsel %vm115_vm5, %v347_v20, %v114_v22  ;;  %v138_v19 = vmul.f32 %v137_v33, %v354_v31  ;;  %v161_v46 = vmul.f32 %v230_v5, %v160_v38 }
  0x29   :  { %185 = vst.msk [vmem:[#allocation7 + $0x4] sm:$0xf] %vm371_vm2, %v107_v29  ;;  %v119_v15 = vsel %vm117_vm6, %v118_v57, %v116_v32  ;;  %v128_v20 = vsel %vm127_vm7, %v352_v30, %v126_v35  ;;  %v150_v50 = vmul.f32 %v149_v39, %v359_v41  ;;  %v166_v51 = vand.u32 2147483648, %v361_v42 }
  0x2a   :  { %186 = vst.msk [vmem:[#allocation7 + $0x8] sm:$0xf] %vm371_vm2, %v119_v15  ;;  %v131_v44 = vsel %vm129_vm8, %v130_v0, %v128_v20  ;;  %v140_v45 = vsel %vm139_vm9, %v354_v31, %v138_v19  ;;  %v171_v52 = vmul.f32 0.5, %v170_v43  ;;  %v162_v30 = vmul.f32 %v161_v46, %v361_v42 }
  0x2b   :  { %187 = vst.msk [vmem:[#allocation7 + $0xc] sm:$0xf] %vm371_vm2, %v131_v44  ;;  %v143_v47 = vsel %vm141_vm10, %v142_v16, %v140_v45  ;;  %v152_v53 = vsel %vm151_vm11, %v359_v41, %v150_v50  ;;  %vm177_vm0 = vcmp.eq.f32.partialorder %v369_v48, 0.0 }
  0x2c   :  { %188 = vst.msk [vmem:[#allocation7 + $0x10] sm:$0xf] %vm371_vm2, %v143_v47  ;;  %v172_v54 = vsub.f32 1.5, %v171_v52  ;;  %v155_v31 = vsel %vm153_vm12, %v154_v40, %v152_v53  ;;  %v164_v55 = vsel %vm163_vm13, %v361_v42, %v162_v30 }
  0x2d   :  { %189 = vst.msk [vmem:[#allocation7 + $0x14] sm:$0xf] %vm371_vm2, %v155_v31  ;;  %v167_v56 = vsel %vm165_vm14, %v166_v51, %v164_v55 }
  0x2e   :  { %v173_v57 = vmul.f32 %v232_v18, %v172_v54  ;;  %190 = vst.msk [vmem:[#allocation7 + $0x18] sm:$0xf] %vm371_vm2, %v167_v56 }
  0x30   :  { %v174_v59 = vmul.f32 %v173_v57, %v369_v48 }
  0x32   :  { %v176_v41 = vsel %vm175_vm15, %v369_v48, %v174_v59 }
  0x33   :  { %v179_v60 = vsel %vm177_vm0, %v178_v58, %v176_v41 }
  0x34   :  { %191 = vst.msk [vmem:[#allocation7 + $0x1c] sm:$0xf] %vm371_vm2, %v179_v60 }
  0x35   :  { %195 = vsyncadd [#allocation4], 448  ;;  %s198_s21 = sshll.u32 %s467_s2, 4  ;;  %s315_s22 = smov [#allocation7]   ;;  %s199_s21 = int_to_ptr.hbm [resolvable:$true] %s198_s21 }
  0x36   :  { %s196_s23 = sshll.u32 %s315_s22, 4  ;;  %s197_s23 = int_to_ptr.vmem [resolvable:$true] %s196_s23 }
  0x37   :  { %204 = dma.vmem_to_hbm [thread:$0]  %s197_s23, 64, %s199_s21, [#allocation4], %s312_s14, %s312_s14, %s313_s15  }
  0x38   :  { %309 = dma.done.wait [#allocation4], 512  }
  0x39   :  { %310 = vsyncadd [#allocation4], 4294966784 }
  0x3a   :  { %209 = vsyncpa [#allocation3], 1 }
  0x3b   :  { %210 = vsyncpa [#allocation6], 1 }
  0x3c   :  { %211 = vsyncpa [#allocation4], 1 }

</bundles_post_ra>
